<compile_context>
chip_gen: v7x
topology: tpu7x:2x2x1
jax: 0.10.0
libtpu: 0.0.40
codegen_flags: <defaults>
</compile_context>

<pallas_src>
import functools
import math

import jax
import jax.numpy as jnp
from jax.experimental import pallas as pl
from jax.experimental.pallas import tpu as pltpu


# ----------------------------------------------------------------------------
# Generation-aware VMEM budgeting.
# ----------------------------------------------------------------------------
@functools.lru_cache(maxsize=1)
def _vmem_caps():
    """Returns (block_footprint_budget_bytes, vmem_limit_bytes)."""
    cap = None
    try:
        info = pltpu.get_tpu_info()
        cap = getattr(info, "vmem_capacity_bytes", None)
    except Exception:  # info query unavailable -> conservative default
        cap = None
    if cap is None:
        cap = 64 * 1024 * 1024
    if cap >= 96 * 1024 * 1024:
        # v5e / v6e: 128 MiB physical VMEM.
        return 48 * 1024 * 1024, 96 * 1024 * 1024
    # v7x: 64 MiB per TensorCore.
    return 24 * 1024 * 1024, 48 * 1024 * 1024


def _sublane(dtype):
    """Sublane packing multiple: 8 (f32), 16 (bf16), 32 (8-bit)."""
    return max(8, 32 // jnp.dtype(dtype).itemsize)


# ----------------------------------------------------------------------------
# Kernels.
# ----------------------------------------------------------------------------
def _sigmoid(g):
    # sigmoid(g) == 0.5 * (tanh(g / 2) + 1): single EUP op, no VALU divide,
    # computed in g's native dtype (bf16-native on v6e/v7x).
    return 0.5 * (jnp.tanh(g * 0.5) + 1.0)


def _glu_pair_kernel(out_ref, gate_ref, o_ref):
    # Halves already delivered as separate aligned tiles by DMA.
    o_ref[...] = (out_ref[...] * _sigmoid(gate_ref[...])).astype(o_ref.dtype)


def _glu_fused_kernel(x_ref, o_ref):
    # Contiguous full-row DMA; split inside the kernel (free when half % 128 == 0).
    half = o_ref.shape[-1]
    out = x_ref[..., :half]
    gate = x_ref[..., half:]
    o_ref[...] = (out * _sigmoid(gate)).astype(o_ref.dtype)


# ----------------------------------------------------------------------------
# Block sizing.
# ----------------------------------------------------------------------------
def _pick_rows(R, half, itemsize, dtype):
    """Rows per block: 2 input halves + 1 output half, double-buffered."""
    budget, _ = _vmem_caps()
    sub = _sublane(dtype)
    row_bytes = 6 * half * itemsize
    rows = budget // max(1, row_bytes)
    # Guarantee multiple grid steps when R allows it (v7x megacore sharding
    # plus DMA/compute overlap): >=4 steps preferred, >=2 minimum.
    if R >= 4 * sub:
        min_steps = 4
    elif R >= 2 * sub:
        min_steps = 2
    else:
        min_steps = 1
    rows = min(rows, pl.cdiv(R, min_steps))
    if rows >= R:
        return R  # full extent satisfies the (8,128) rule
    return max(sub, (rows // sub) * sub)


# ----------------------------------------------------------------------------
# Last-axis GLU.
# ----------------------------------------------------------------------------
def _glu_last_axis(x):
    shape = x.shape
    D = shape[-1]
    half = D // 2
    R = math.prod(shape[:-1]) if len(shape) > 1 else 1
    x2 = x.reshape(R, D)
    itemsize = jnp.dtype(x.dtype).itemsize
    budget, vmem_limit = _vmem_caps()
    sub = _sublane(x.dtype)
    out_shape_full = shape[:-1] + (half,)

    lane_aligned = half % 128 == 0
    if lane_aligned and 6 * half * sub * itemsize > budget:
        # Extremely wide split: tile the half (lane) axis too.
        return _glu_last_axis_wide(x2, out_shape_full, half, itemsize)
    # TODO(synk): half not a multiple of 128 AND wider than the budget would
    # still exceed the footprint target; not expected for GLU-sized widths.

    rows = _pick_rows(R, half, itemsize, x.dtype)
    grid = (pl.cdiv(R, rows),)

    # Dual-BlockSpec halves only pay when each half-row DMA burst is long;
    # small halves keep one contiguous (rows, D) DMA + free in-kernel slice.
    use_dual = lane_aligned and (half * itemsize >= 2048)
    if use_dual:
        kernel = _glu_pair_kernel
        in_specs = [
            pl.BlockSpec((rows, half), lambda i: (i, 0)),
            pl.BlockSpec((rows, half), lambda i: (i, 1)),
        ]
        operands = (x2, x2)
    else:
        # TODO(synk): for half % 128 != 0 (e.g. half=64) the output is
        # lane-sparse (masked stores); packing two rows per 128-lane store
        # via pltpu.roll is a possible second-pass optimization.
        kernel = _glu_fused_kernel
        in_specs = [pl.BlockSpec((rows, D), lambda i: (i, 0))]
        operands = (x2,)

    out2 = pl.pallas_call(
        kernel,
        out_shape=jax.ShapeDtypeStruct((R, half), x.dtype),
        grid_spec=pltpu.PrefetchScalarGridSpec(
            num_scalar_prefetch=0,
            grid=grid,
            in_specs=in_specs,
            out_specs=pl.BlockSpec((rows, half), lambda i: (i, 0)),
        ),
        compiler_params=pltpu.CompilerParams(
            dimension_semantics=("parallel",),
            vmem_limit_bytes=vmem_limit,
        ),
    )(*operands)
    return out2.reshape(out_shape_full)


def _glu_last_axis_wide(x2, out_shape_full, half, itemsize):
    """Very wide lane-aligned split: tile both the row and the half axes."""
    budget, vmem_limit = _vmem_caps()
    dtype = x2.dtype
    sub = _sublane(dtype)
    R, _ = x2.shape

    m = half // 128
    k_cap = max(1, budget // (6 * 128 * sub * itemsize))
    k = 1
    for cand in range(min(m, k_cap), 0, -1):
        if m % cand == 0:
            k = cand
            break
    hb = 128 * k
    n_lane_blocks = half // hb

    rows = budget // (6 * hb * itemsize)
    if rows >= R:
        rows = R
    else:
        rows = max(sub, (rows // sub) * sub)

    grid = (pl.cdiv(R, rows), n_lane_blocks)
    out2 = pl.pallas_call(
        _glu_pair_kernel,
        out_shape=jax.ShapeDtypeStruct((R, half), dtype),
        grid_spec=pltpu.PrefetchScalarGridSpec(
            num_scalar_prefetch=0,
            grid=grid,
            in_specs=[
                pl.BlockSpec((rows, hb), lambda i, j: (i, j)),
                pl.BlockSpec((rows, hb), lambda i, j: (i, j + n_lane_blocks)),
            ],
            out_specs=pl.BlockSpec((rows, hb), lambda i, j: (i, j)),
        ),
        compiler_params=pltpu.CompilerParams(
            dimension_semantics=("parallel", "parallel"),
            vmem_limit_bytes=vmem_limit,
        ),
    )(x2, x2)
    return out2.reshape(out_shape_full)


# ----------------------------------------------------------------------------
# Non-minor split axis (no transpose): split via BlockSpec index_map.
# ----------------------------------------------------------------------------
def _glu_middle_axis(x, axis):
    shape = x.shape
    D = shape[axis]
    half = D // 2
    pre = math.prod(shape[:axis]) if axis > 0 else 1
    post = math.prod(shape[axis + 1:])
    x3 = x.reshape(pre, D, post)
    itemsize = jnp.dtype(x.dtype).itemsize
    budget, vmem_limit = _vmem_caps()

    # Lane (post) block: full extent, or a multiple of 128.
    col_bytes = 6 * half * itemsize
    if col_bytes * post <= budget:
        postb = post
    else:
        postb = max(128, (budget // col_bytes) // 128 * 128)
        postb = min(postb, post)
    pb = max(1, budget // max(1, col_bytes * postb))
    if pre >= 2:
        # Keep >= 2 grid steps along pre (v7x megacore / pipeline overlap).
        pb = min(pb, pl.cdiv(pre, 2))
    pb = min(pb, pre)

    grid = (pl.cdiv(pre, pb), pl.cdiv(post, postb))
    out3 = pl.pallas_call(
        _glu_pair_kernel,
        out_shape=jax.ShapeDtypeStruct((pre, half, post), x.dtype),
        grid_spec=pltpu.PrefetchScalarGridSpec(
            num_scalar_prefetch=0,
            grid=grid,
            in_specs=[
                pl.BlockSpec((pb, half, postb), lambda i, j: (i, 0, j)),
                pl.BlockSpec((pb, half, postb), lambda i, j: (i, 1, j)),
            ],
            out_specs=pl.BlockSpec((pb, half, postb), lambda i, j: (i, 0, j)),
        ),
        compiler_params=pltpu.CompilerParams(
            dimension_semantics=("parallel", "parallel"),
            vmem_limit_bytes=vmem_limit,
        ),
    )(x3, x3)
    return out3.reshape(shape[:axis] + (half,) + shape[axis + 1:])


# ----------------------------------------------------------------------------
# Public entry point (matches PyTorch GLU.forward semantics).
# ----------------------------------------------------------------------------
@functools.partial(jax.jit, static_argnames=("dim",))
def glu(x, dim=-1):
    """Split x into (out, gate) halves along `dim`; return out * sigmoid(gate)."""
    axis = dim % x.ndim
    D = x.shape[axis]
    assert D % 2 == 0, "GLU requires an even split dimension"
    half = D // 2
    sub = _sublane(x.dtype)

    if axis == x.ndim - 1:
        return _glu_last_axis(x)

    post = math.prod(x.shape[axis + 1:])
    budget, _ = _vmem_caps()
    itemsize = jnp.dtype(x.dtype).itemsize
    # No-transpose middle-axis split only when output is lane-dense
    # (post >= 128), the half block respects sublane packing, and a
    # minimum-size block fits the VMEM budget.
    if half % sub == 0 and post >= 128 and 6 * half * 128 * itemsize <= budget:
        return _glu_middle_axis(x, axis)

    # Lane-sparse or unaligned non-minor split: one extra HBM pass (moveaxis)
    # buys a lane-dense kernel, which is the bigger measured lever.
    xm = jnp.moveaxis(x, axis, -1)
    ym = _glu_last_axis(xm)
    return jnp.moveaxis(ym, -1, axis)


def _ref_glu(x, dim=-1):
    out, gate = jnp.split(x, 2, axis=dim)
    return out * jax.nn.sigmoid(gate)


if __name__ == "__main__":
    key = jax.random.PRNGKey(0)
    k1, k2, k3, k4, k5, k6 = jax.random.split(key, 6)

    # 1) Small module-consistent shape: (batch=2, seq=8, hidden=128), dim=-1
    #    (half=64 -> unaligned, in-kernel split path).
    x1 = jax.random.normal(k1, (2, 8, 128), dtype=jnp.float32)
    y1 = jax.block_until_ready(glu(x1, dim=-1))
    r1 = _ref_glu(x1, dim=-1)
    assert y1.shape == r1.shape
    assert jnp.allclose(y1, r1, atol=1e-5, rtol=1e-5)

    # 2) Lane-aligned small half (half=128 -> contiguous full-row DMA + free slice).
    x2 = jax.random.normal(k2, (4, 16, 256), dtype=jnp.float32)
    y2 = jax.block_until_ready(glu(x2, dim=-1))
    r2 = _ref_glu(x2, dim=-1)
    assert y2.shape == r2.shape
    assert jnp.allclose(y2, r2, atol=1e-5, rtol=1e-5)

    # 3) Lane-aligned large half (half=1024 f32 -> dual-BlockSpec path).
    x3 = jax.random.normal(k3, (2, 8, 2048), dtype=jnp.float32)
    y3 = jax.block_until_ready(glu(x3, dim=-1))
    r3 = _ref_glu(x3, dim=-1)
    assert y3.shape == r3.shape
    assert jnp.allclose(y3, r3, atol=1e-5, rtol=1e-5)

    # 4) Non-minor split, lane-dense trailing extent (post=128 -> no transpose).
    x4 = jax.random.normal(k4, (2, 16, 128), dtype=jnp.float32)
    y4 = jax.block_until_ready(glu(x4, dim=1))
    r4 = _ref_glu(x4, dim=1)
    assert y4.shape == r4.shape
    assert jnp.allclose(y4, r4, atol=1e-5, rtol=1e-5)

    # 5) Non-minor split, lane-sparse trailing extent (post=8 -> moveaxis fallback).
    x5 = jax.random.normal(k5, (2, 64, 8), dtype=jnp.float32)
    y5 = jax.block_until_ready(glu(x5, dim=1))
    r5 = _ref_glu(x5, dim=1)
    assert y5.shape == r5.shape
    assert jnp.allclose(y5, r5, atol=1e-5, rtol=1e-5)

    # 6) bf16 input (native bf16 compute on v6e/v7x, 16-row sublane packing).
    x6 = jax.random.normal(k6, (4, 16, 256), dtype=jnp.bfloat16)
    y6 = jax.block_until_ready(glu(x6, dim=-1))
    r6 = _ref_glu(x6.astype(jnp.float32), dim=-1).astype(jnp.bfloat16)
    assert y6.shape == r6.shape
    assert jnp.allclose(y6.astype(jnp.float32), r6.astype(jnp.float32),
                        atol=5e-2, rtol=5e-2)

    print("KERNEL_OK")
</pallas_src>

<mosaic_0001>
module attributes {stable_mosaic.version = 11 : i64} {
  func.func @_glu_fused_kernel(%arg0: i32, %arg1: memref<8x128xf32, #tpu.memory_space<vmem>>, %arg2: memref<8x64xf32, #tpu.memory_space<vmem>>) attributes {dimension_semantics = [#tpu.dimension_semantics<parallel>], iteration_bounds = array<i64: 2>, scalar_prefetch = 0 : i64, scratch_operands = 0 : i64, tpu.core_type = #tpu.core_type<tc>, window_params = [{transform_indices = @transform_0, window_bounds = array<i64: 8, 128>}, {transform_indices = @transform_1, window_bounds = array<i64: 8, 64>}]} {
    %c0 = arith.constant 0 : index
    %c0_0 = arith.constant 0 : index
    %0 = vector.load %arg1[%c0, %c0_0] : memref<8x128xf32, #tpu.memory_space<vmem>>, vector<8x64xf32>
    %c0_1 = arith.constant 0 : index
    %c64 = arith.constant 64 : index
    %1 = vector.load %arg1[%c0_1, %c64] : memref<8x128xf32, #tpu.memory_space<vmem>>, vector<8x64xf32>
    %cst = arith.constant 5.000000e-01 : f32
    %2 = vector.broadcast %cst : f32 to vector<8x64xf32>
    %3 = arith.mulf %1, %2 : vector<8x64xf32>
    %4 = math.tanh %3 : vector<8x64xf32>
    %cst_2 = arith.constant 1.000000e+00 : f32
    %5 = vector.broadcast %cst_2 : f32 to vector<8x64xf32>
    %6 = arith.addf %4, %5 : vector<8x64xf32>
    %cst_3 = arith.constant 5.000000e-01 : f32
    %7 = vector.broadcast %cst_3 : f32 to vector<8x64xf32>
    %8 = arith.mulf %7, %6 : vector<8x64xf32>
    %9 = arith.mulf %0, %8 : vector<8x64xf32>
    %c0_4 = arith.constant 0 : index
    %c0_5 = arith.constant 0 : index
    %10 = vector.load %arg2[%c0_4, %c0_5] : memref<8x64xf32, #tpu.memory_space<vmem>>, vector<8x64xf32>
    tpu.vector_store %arg2[%c0_4, %c0_5], %9 {strides = array<i32>} : memref<8x64xf32, #tpu.memory_space<vmem>>, vector<8x64xf32>,
    return
  }
  func.func @transform_0(%arg0: i32) -> (i32, i32) {
    %c0_i32 = arith.constant 0 : i32
    %c0_i32_0 = arith.constant 0 : i32
    return %arg0, %c0_i32 : i32, i32
  }
  func.func @transform_1(%arg0: i32) -> (i32, i32) {
    %c0_i32 = arith.constant 0 : i32
    %c0_i32_0 = arith.constant 0 : i32
    return %arg0, %c0_i32 : i32, i32
  }
}

</mosaic_0001>

<bundles_post_ra>
// kernel: glu.1
= control target key start
LH: loop header
LB: loop body
LE: loop exit
PB: predicated region body
PF: predicated region fallthrough
CT: control target
= control target key end

     0   :  { %6 = vsyncpa [#allocation3], 0  ;;  %s561_s0 = inlined_call_operand.hbm [shape: f32[16,128], index: 0, kind: input, shape index: {}]   ;;  %s562_s1 = inlined_call_operand.hbm [shape: f32[16,64], index: 1, kind: output, shape index: {}]  }
   0x1   :  { %8 = vsyncpa [#allocation3 + $0x1], 0 }
   0x2   :  { %9 = vsyncpa [#allocation4], 0 }
   0x3   :  { %11 = vsyncpa [#allocation4 + $0x1], 0  ;;  %s400_s6 = smov 0   ;;  %s402_s7 = smov 0  }
   0x4   :  { %s404_s8 = smov 0   ;;  %s406_s9 = smov 0  }
   0x5 LB: > { %s421_s10 = sadd.s32 4294967295, %s385_s9   ;;  %s228_s11 = sadd.s32 4294967294, %s385_s9   ;;  %s385_s9 = sphi %s406_s9, %s577_s9   ;;  %s381_s8 = sphi %s404_s8, %s576_s8   ;;  %s377_s7 = sphi %s402_s7, %s575_s7   ;;  %s373_s6 = sphi %s400_s6, %s574_s6  }
   0x6   : > { %s425_s12 = sadd.s32 1, %s385_s9   ;;  %s24_s13 = sadd.s32 1, %s381_s8 }
   0x7   : > { %s21_s14 = ssub.s32 %s385_s9, %s425_s12  ;;  %p31_p0 = scmp.ne.s32.totalorder %s381_s8, %s377_s7 }
   0x8   : > { %p22_p1 = scmp.eq.s32.totalorder %s21_s14, 0  ;;  %p32_p2 = scmp.eq.s32.totalorder %s385_s9, 0 }
   0x9   : > { %p37_p3 = scmp.ne.s32.totalorder %s377_s7, %s373_s6  ;;  %p38_p4 = scmp.eq.s32.totalorder %s421_s10, 0 }
   0xa   : > { %s437_s15 = scalar_select %p22_p1, %s381_s8, %s24_s13  }
   0xb   : > { %p439_p5 = por %p32_p2, %p31_p0  ;;  %p443_p6 = por %p38_p4, %p37_p3 }
   0xc   : > { %p61_p7 = scmp.eq.s32.totalorder %s421_s10, 1  ;;  %p67_p8 = scmp.eq.s32.totalorder %s228_s11, 1 }
   0xd   : > { %p252_p10 = scmp.lt.s32.totalorder %s385_s9, 2  ;;  %s87_s20 = sand.u32 1, %s381_s8  }
   0xe   : > { %p450_p11 = por %p61_p7, %p31_p0  ;;  %p454_p12 = por %p67_p8, %p37_p3 }
   0xf   : > { %s232_s21 = sshll.u32 %s385_s9, 7  ;;  %s231_s22 = sshll.u32 %s87_s20, 3 }
  0x10   : > { %s566_s18 = scalar_select %p450_p11, 1, 0 }
  0x11   : > { %s567_s19 = scalar_select %p454_p12, 1, 0 }
  0x12   : > { %s463_s25 = scalar_lea.hbm %s561_s0, %s232_s21  ;;  %s91_s26 = scalar_lea.vmem [#allocation2], %s231_s22 }
  0x13   : > { %s98_s27 = sshll.u32 %s91_s26, 4  ;;  %p467_p13 = pnand %p252_p10, %p439_p5  ;;  %s471_s27 = int_to_ptr.vmem [resolvable:$true] %s98_s27 }
  0x14   : > { %s88_s29 = scalar_lea.sflag [#allocation3], %s87_s20  ;;  %s289_s30 = scalar_lea.hbm %s463_s25, 128 }
  0x15   : > { %p290_p2 = scmp.ne.s32.totalorder %s463_s25, %s289_s30  ;;  %p291_p3 = pneg %p467_p13 }
  0x16   : > { %s294_s4 = scalar_lea.hbm %s561_s0, 256  ;;  %p295_p5 = scmp.lt.u32.totalorder %s463_s25, %s561_s0 }
  0x17   : > { %p292_p4 = pnand %p291_p3, %p290_p2  ;;  %p296_p8 = scmp.lt.u32.totalorder %s294_s4, %s289_s30 }
  0x18   : > { %p298_p9 = scmp.lt.u32.totalorder %s289_s30, %s463_s25 }
  0x19   : > { %p293_p7 = pneg %p292_p4  ;;  %p297_p10 = por %p296_p8, %p295_p5 }
  0x1b   : > { %p299_p0 = por %p298_p9, %p297_p10 }
  0x1d   : > { %p300_p1 = pnand %p299_p0, %p293_p7 }
  0x1f   : > { %303 = shalt.err (!%p300_p1)
}
  0x20   : > { %s304_s13 = scalar_lea.vmem %s471_s27, 128  ;;  %s387_s14 = smov [#allocation2]  }
  0x21   : > { %p305_p2 = scmp.ne.s32.totalorder %s471_s27, %s304_s13  ;;  %s309_s16 = sshll.u32 %s387_s14, 4  ;;  %s310_s16 = int_to_ptr.vmem [resolvable:$false] %s309_s16 }
  0x22   : > { %s311_s20 = scalar_lea.vmem %s310_s16, 256  ;;  %p312_p11 = scmp.lt.s32.totalorder %s471_s27, %s310_s16 }
  0x23   : > { %p307_p4 = pnand %p305_p2, %p291_p3  ;;  %p313_p5 = scmp.lt.s32.totalorder %s311_s20, %s304_s13 }
  0x25   : > { %p308_p12 = pneg %p307_p4  ;;  %p314_p8 = por %p313_p5, %p312_p11 }
  0x27   : > { %p315_p9 = pnand %p314_p8, %p308_p12 }
  0x29   : > { %318 = shalt.err (!%p315_p9)
}
  0x2a   : > { %247 = dma.hbm_to_vmem [thread:$0]  (!%p467_p13), %s463_s25, 128, %s471_s27, %s88_s29  }
  0x2b   : > { %p569_p0 = scmp.lt.s32.totalorder %s385_s9, 3  ;;  %p570_p1 = scmp.ge.s32.totalorder %s385_s9, 1 }
  0x2d   : > { %p104_p3 = pnand %p570_p1, %p569_p0 }
  0x2e   : > { %s505_s21 = sand.u32 (!%p104_p3), 1, %s377_s7  }
  0x2f   : > { %107 = sbr.rel (%p104_p3) target bundleno = 204 (0xcc), region = 24  ;;  %s234_s22 = sshll.u32 (!%p104_p3), %s505_s21, 3 }
  0x30   : > { %s110_s23 = scalar_lea.sflag (!%p104_p3), [#allocation3], %s505_s21  ;;  %s113_s24 = scalar_lea.vmem (!%p104_p3), [#allocation2], %s234_s22 }
  0x36   : > { %364 = dma.done.wait (%p443_p6), %s110_s23, 128  }
  0x37   : > { %366 = vsyncadd (%p443_p6), %s110_s23, 4294967168  ;;  %v132_v0 = vld [vmem:[%s113_s24] sm:$0xff]  ;;  %s388_s25 = smov 64   ;;  %s237_s26 = sshll.u32 %s421_s10, 7  ;;  %vm142_vm0 = vcmask 523264  }
  0x38   : > { %v133_v1 = vmul.f32 0.5, %v132_v0  ;;  %s131_s27 = scalar_lea.vmem [#allocation5], %s234_s22  ;;  %s517_s30 = scalar_lea.hbm %s562_s1, %s237_s26 }
  0x39   : > { %s158_s28 = sshll.u32 %s131_s27, 4  ;;  %s145_s2 = scalar_lea.sflag [#allocation4], %s505_s21  ;;  %s519_s28 = int_to_ptr.vmem [resolvable:$true] %s158_s28 }
  0x3a   : > { %287 = vtanh.f32 %v133_v1  ;;  %s319_s3 = scalar_lea.vmem %s519_s28, 128  ;;  %p571_p11 = scmp.ne.s32.totalorder %s566_s18, 0 }
  0x3b   : > { %p320_p6 = scmp.ne.s32.totalorder %s519_s28, %s319_s3  ;;  %s389_s10 = smov [#allocation5]  }
  0x3c   : > { %s323_s4 = sshll.u32 %s389_s10, 4  ;;  %s324_s4 = int_to_ptr.vmem [resolvable:$false] %s323_s4 }
  0x3d   : > { %p321_p12 = pnand %p320_p6, %p571_p11  ;;  %s325_s5 = scalar_lea.vmem %s324_s4, 256 }
  0x3e   : > { %p326_p7 = scmp.lt.s32.totalorder %s519_s28, %s324_s4  ;;  %p327_p10 = scmp.lt.s32.totalorder %s325_s5, %s319_s3 }
  0x3f   : > { %p322_p13 = pneg %p321_p12 }
  0x40   : > { %p328_p2 = por %p327_p10, %p326_p7 }
  0x42   : > { %p329_p4 = pnand %p328_p2, %p322_p13 }
  0x44   : > { %v288_v2 = vpop.eup %287 }
  0x45   : > { %v135_v3 = vadd.f32 1.0, %v288_v2 }
  0x47   : > { %v136_v4 = vmul.f32 0.5, %v135_v3 }
  0x49   : > { %138 = vrot.lane.b32.xlu0 %v136_v4, %s388_s25 }
  0xbb   : > { %v139_v5 = vpop.permute.xlu0 %138 }
  0xbc   : > { %v141_v6 = vmul.f32 %v139_v5, %v132_v0 }
  0xbe   : > { %143 = vst.msk [vmem:[%s131_s27] sm:$0xff] %vm142_vm0, %v141_v6 }
  0xbf   : > { %332 = shalt.err (!%p329_p4)
}
  0xc0   : > { %s333_s11 = scalar_lea.hbm %s517_s30, 128  ;;  %s337_s16 = scalar_lea.hbm %s562_s1, 256 }
  0xc1   : > { %p334_p5 = scmp.ne.s32.totalorder %s517_s30, %s333_s11  ;;  %p338_p0 = scmp.lt.u32.totalorder %s517_s30, %s562_s1 }
  0xc2   : > { %p339_p1 = scmp.lt.u32.totalorder %s337_s16, %s333_s11  ;;  %p341_p6 = scmp.lt.u32.totalorder %s333_s11, %s517_s30 }
  0xc3   : > { %p335_p8 = pnand %p334_p5, %p571_p11 }
  0xc4   : > { %p340_p3 = por %p339_p1, %p338_p0 }
  0xc5   : > { %p336_p9 = pneg %p335_p8 }
  0xc6   : > { %p342_p12 = por %p341_p6, %p340_p3 }
  0xc8   : > { %p343_p13 = pnand %p342_p12, %p336_p9 }
  0xca   : > { %346 = shalt.err (!%p343_p13)
}
  0xcb   : > { %242 = dma.vmem_to_hbm [thread:$0]  (%p571_p11), %s519_s28, 128, %s517_s30, %s145_s2  }
  0xcc PF: > { %s170_s22 = sand.u32 1, %s373_s6   ;;  %p572_p7 = scmp.ne.s32.totalorder %s567_s19, 0 }
  0xcd   : > { %p573_p10 = scmp.ge.s32.totalorder %s385_s9, 2  ;;  %s171_s23 = scalar_lea.sflag [#allocation4], %s170_s22 }
  0xcf   : > { %p249_p2 = pnand %p573_p10, %p572_p7 }
  0xd1   : > { %368 = dma.done.wait (!%p249_p2), %s171_s23, 128  }
  0xd2   : > { %370 = vsyncadd (!%p249_p2), %s171_s23, 4294967168  ;;  %p14_p4 = scmp.ge.s32.totalorder %s425_s12, 4   ;;  %s574_s6 = smov %s377_s7 }
  0xd3   : > { %s575_s7 = smov %s381_s8  ;;  %s576_s8 = smov %s437_s15 }
  0xd4   : > { %s577_s9 = smov %s425_s12  ;;  %16 = sbr.rel (!%p14_p4) target bundleno = 5 (0x5), region = 69 }
  0xdb   :  { %176 = vsyncpa [#allocation3], 1 }
  0xdc   :  { %178 = vsyncpa [#allocation3 + $0x1], 1 }
  0xdd   :  { %179 = vsyncpa [#allocation4], 1 }
  0xde   :  { %181 = vsyncpa [#allocation4 + $0x1], 1 }

</bundles_post_ra>
